<compile_context>
chip_gen: v7x
topology: tpu7x:2x2x1
jax: 0.10.0
libtpu: 0.0.40
codegen_flags: <defaults>
</compile_context>

<pallas_src>
import functools

import jax
import jax.numpy as jnp
from jax import lax
from jax.experimental import pallas as pl
from jax.experimental.pallas import tpu as pltpu


def resnet_kernel(x_ref, w1_ref, b1_ref, w2_ref, b2_ref, mask_ref, out_ref, *, W):
    # x_ref:    (1, C, HW)    one batch element, channels on sublanes, pixels on lanes
    # w1_ref:   (Cm, C)       1x1 conv weight, bf16
    # b1_ref:   (Cm, 1)       1x1 conv bias, f32
    # w2_ref:   (C, 9*Cm)     3x3 conv weight, im2col layout (dy, dx, ci), bf16
    # b2_ref:   (C, 1)        3x3 conv bias, f32
    # mask_ref: (9, 1, HW)    1.0 where tap (dy,dx) is inside the image, else 0.0
    # out_ref:  (1, C, HW)
    _, _, HW = x_ref.shape

    x = x_ref[0]                                              # (C, HW) f32

    # ---- 1x1 conv: one MXU matmul (bf16 operands, f32 accumulation) ----
    mid = jnp.dot(w1_ref[...], x.astype(jnp.bfloat16),
                  preferred_element_type=jnp.float32)         # (Cm, HW)
    mid = mid + b1_ref[...]                                   # f32 bias over lanes

    # ---- im2col for the 3x3 conv: 9 taps = XLU lane rolls + zero-pad masks ----
    taps = []
    k = 0
    for dy in range(3):
        for dx in range(3):
            off = (dy - 1) * W + (dx - 1)                     # flat spatial offset
            shift = (-off) % HW                               # np.roll convention
            t = mid if shift == 0 else pltpu.roll(mid, shift, axis=1)
            taps.append(t * mask_ref[k])                      # zero the padded taps
            k += 1
    im2col = jnp.concatenate(taps, axis=0).astype(jnp.bfloat16)   # (9*Cm, HW)

    # ---- 3x3 conv: ONE fused MXU matmul over K = 9*Cm ----
    y = jnp.dot(w2_ref[...], im2col,
                preferred_element_type=jnp.float32)           # (C, HW)
    y = y + b2_ref[...]                                       # f32 bias

    # ---- residual add in f32, lane-dense unmasked store ----
    out_ref[0] = (x + y).astype(out_ref.dtype)


@functools.partial(jax.jit, static_argnames=("w",))
def _resnet_pallas(x_flat, w1, b1, w2, b2, mask, *, w):
    n, c, hw = x_flat.shape
    cm = w1.shape[0]
    k9 = w2.shape[1]
    return pl.pallas_call(
        functools.partial(resnet_kernel, W=w),
        out_shape=jax.ShapeDtypeStruct((n, c, hw), x_flat.dtype),
        grid_spec=pltpu.PrefetchScalarGridSpec(
            num_scalar_prefetch=0,
            grid=(n,),
            in_specs=[
                pl.BlockSpec((1, c, hw), lambda i: (i, 0, 0)),
                pl.BlockSpec((cm, c), lambda i: (0, 0)),
                pl.BlockSpec((cm, 1), lambda i: (0, 0)),
                pl.BlockSpec((c, k9), lambda i: (0, 0)),
                pl.BlockSpec((c, 1), lambda i: (0, 0)),
                pl.BlockSpec((9, 1, hw), lambda i: (0, 0, 0)),
            ],
            out_specs=pl.BlockSpec((1, c, hw), lambda i: (i, 0, 0)),
        ),
        compiler_params=pltpu.CompilerParams(
            dimension_semantics=("parallel",)),
    )(x_flat, w1, b1, w2, b2, mask)


def _make_tap_mask(H, W):
    """(9, 1, H*W) f32: 1.0 where 3x3 tap (dy, dx) lands inside the image."""
    yi = jnp.repeat(jnp.arange(H), W)            # (H*W,)
    xi = jnp.tile(jnp.arange(W), H)              # (H*W,)
    rows = []
    for dy in range(3):
        for dx in range(3):
            oy, ox = dy - 1, dx - 1
            valid = ((yi + oy >= 0) & (yi + oy < H) &
                     (xi + ox >= 0) & (xi + ox < W))
            rows.append(valid)
    return jnp.stack(rows).astype(jnp.float32).reshape(9, 1, H * W)


def resnet_forward(x_nchw, params):
    """Matches PyTorch ResNet.forward: x + Conv3x3(Conv1x1(x)). NCHW in/out."""
    w1, b1, w2, b2 = params
    n, c, h, w = x_nchw.shape
    x_flat = x_nchw.reshape(n, c, h * w)         # free reshape, no layout transpose
    mask = _make_tap_mask(h, w)
    y_flat = _resnet_pallas(x_flat, w1, b1, w2, b2, mask, w=w)
    return y_flat.reshape(n, c, h, w)


def init_params(key, in_channels):
    """Deterministic synthetic parameters (PyTorch conv shapes, converted)."""
    c, cm = in_channels, in_channels // 2
    k1, k2, k3, k4 = jax.random.split(key, 4)
    # PyTorch conv1 weight: (cm, c, 1, 1) OIHW
    w1 = 0.1 * jax.random.normal(k1, (cm, c, 1, 1), jnp.float32)
    b1 = 0.1 * jax.random.normal(k2, (cm,), jnp.float32)
    # PyTorch conv2 weight: (c, cm, 3, 3) OIHW
    w2 = 0.1 * jax.random.normal(k3, (c, cm, 3, 3), jnp.float32)
    b2 = 0.1 * jax.random.normal(k4, (c,), jnp.float32)

    # Kernel-side layouts: bf16 weights (MXU-native), f32 column-vector biases.
    w1_mat = w1[:, :, 0, 0].astype(jnp.bfloat16)                           # (Cm, C)
    w2_mat = jnp.transpose(w2, (0, 2, 3, 1)).reshape(c, 9 * cm)            # (C, 9*Cm)
    w2_mat = w2_mat.astype(jnp.bfloat16)
    kernel_params = (w1_mat, b1.reshape(cm, 1), w2_mat, b2.reshape(c, 1))
    torch_params = (w1, b1, w2, b2)
    return kernel_params, torch_params


def reference_forward(x_nchw, torch_style_params):
    """Pure-JAX NCHW reference mirroring the PyTorch module exactly (f32)."""
    w1, b1, w2, b2 = torch_style_params
    y = lax.conv_general_dilated(
        x_nchw, w1, window_strides=(1, 1), padding="VALID",
        dimension_numbers=("NCHW", "OIHW", "NCHW"))
    y = y + b1[None, :, None, None]
    y = lax.conv_general_dilated(
        y, w2, window_strides=(1, 1), padding=((1, 1), (1, 1)),
        dimension_numbers=("NCHW", "OIHW", "NCHW"))
    y = y + b2[None, :, None, None]
    return x_nchw + y


if __name__ == "__main__":
    N, C, H, W = 2, 8, 16, 16   # small shapes consistent with the module (C even)
    key = jax.random.PRNGKey(0)
    kx, kp = jax.random.split(key)
    x = jax.random.normal(kx, (N, C, H, W), jnp.float32)

    kernel_params, torch_params = init_params(kp, C)

    out = resnet_forward(x, kernel_params)
    out = jax.block_until_ready(out)

    ref = reference_forward(x, torch_params)
    assert out.shape == ref.shape == (N, C, H, W)
    # bf16 MXU operands (f32 accumulation / bias / residual) -> bf16-level tolerance.
    max_err = float(jnp.max(jnp.abs(out - ref)))
    assert jnp.allclose(out, ref, atol=2e-2, rtol=2e-2), max_err

    print("KERNEL_OK")
</pallas_src>

<mosaic_0001>
module attributes {stable_mosaic.version = 11 : i64} {
  func.func @resnet_kernel(%arg0: i32, %arg1: memref<1x8x256xf32, #tpu.memory_space<vmem>>, %arg2: memref<4x8xbf16, #tpu.memory_space<vmem>>, %arg3: memref<4x1xf32, #tpu.memory_space<vmem>>, %arg4: memref<8x36xbf16, #tpu.memory_space<vmem>>, %arg5: memref<8x1xf32, #tpu.memory_space<vmem>>, %arg6: memref<9x1x256xf32, #tpu.memory_space<vmem>>, %arg7: memref<1x8x256xf32, #tpu.memory_space<vmem>>) attributes {dimension_semantics = [#tpu.dimension_semantics<parallel>], iteration_bounds = array<i64: 2>, scalar_prefetch = 0 : i64, scratch_operands = 0 : i64, tpu.core_type = #tpu.core_type<tc>, window_params = [{transform_indices = @transform_0, window_bounds = array<i64: 1, 8, 256>}, {pipeline_mode = #tpu.pipeline_mode<synchronous>, transform_indices = @transform_1, window_bounds = array<i64: 4, 8>}, {pipeline_mode = #tpu.pipeline_mode<synchronous>, transform_indices = @transform_2, window_bounds = array<i64: 4, 1>}, {pipeline_mode = #tpu.pipeline_mode<synchronous>, transform_indices = @transform_3, window_bounds = array<i64: 8, 36>}, {pipeline_mode = #tpu.pipeline_mode<synchronous>, transform_indices = @transform_4, window_bounds = array<i64: 8, 1>}, {pipeline_mode = #tpu.pipeline_mode<synchronous>, transform_indices = @transform_5, window_bounds = array<i64: 9, 1, 256>}, {transform_indices = @transform_6, window_bounds = array<i64: 1, 8, 256>}]} {
    %c0 = arith.constant 0 : index
    %c0_0 = arith.constant 0 : index
    %c0_1 = arith.constant 0 : index
    %0 = vector.load %arg1[%c0, %c0_0, %c0_1] : memref<1x8x256xf32, #tpu.memory_space<vmem>>, vector<1x8x256xf32>
    %1 = vector.shape_cast %0 : vector<1x8x256xf32> to vector<8x256xf32>
    %c0_2 = arith.constant 0 : index
    %c0_3 = arith.constant 0 : index
    %2 = vector.load %arg2[%c0_2, %c0_3] : memref<4x8xbf16, #tpu.memory_space<vmem>>, vector<4x8xbf16>
    %3 = arith.truncf %1 : vector<8x256xf32> to vector<8x256xbf16>
    %cst = arith.constant dense<0.000000e+00> : vector<4x256xf32>
    %4 = tpu.matmul %2, %3, %cst {dimension_numbers = #tpu.dot_dimension_numbers<[1], [0], [0], [1], [0, 0, 1, 1], [], []>} : vector<4x8xbf16>, vector<8x256xbf16>, vector<4x256xf32> -> vector<4x256xf32>
    %c0_4 = arith.constant 0 : index
    %c0_5 = arith.constant 0 : index
    %5 = vector.load %arg3[%c0_4, %c0_5] : memref<4x1xf32, #tpu.memory_space<vmem>>, vector<4x1xf32>
    %6 = vector.broadcast %5 : vector<4x1xf32> to vector<4x256xf32>
    %7 = arith.addf %4, %6 : vector<4x256xf32>
    %c17_i32 = arith.constant 17 : i32
    %8 = tpu.dynamic_rotate %7 by %c17_i32 dim 1 : vector<4x256xf32>, i32 -> vector<4x256xf32>
    %c0_6 = arith.constant 0 : index
    %c0_7 = arith.constant 0 : index
    %c0_8 = arith.constant 0 : index
    %9 = vector.load %arg6[%c0_6, %c0_7, %c0_8] : memref<9x1x256xf32, #tpu.memory_space<vmem>>, vector<1x1x256xf32>
    %10 = vector.shape_cast %9 : vector<1x1x256xf32> to vector<1x256xf32>
    %11 = vector.broadcast %10 : vector<1x256xf32> to vector<4x256xf32>
    %12 = arith.mulf %8, %11 : vector<4x256xf32>
    %c16_i32 = arith.constant 16 : i32
    %13 = tpu.dynamic_rotate %7 by %c16_i32 dim 1 : vector<4x256xf32>, i32 -> vector<4x256xf32>
    %c1 = arith.constant 1 : index
    %c0_9 = arith.constant 0 : index
    %c0_10 = arith.constant 0 : index
    %14 = vector.load %arg6[%c1, %c0_9, %c0_10] : memref<9x1x256xf32, #tpu.memory_space<vmem>>, vector<1x1x256xf32>
    %15 = vector.shape_cast %14 : vector<1x1x256xf32> to vector<1x256xf32>
    %16 = vector.broadcast %15 : vector<1x256xf32> to vector<4x256xf32>
    %17 = arith.mulf %13, %16 : vector<4x256xf32>
    %c15_i32 = arith.constant 15 : i32
    %18 = tpu.dynamic_rotate %7 by %c15_i32 dim 1 : vector<4x256xf32>, i32 -> vector<4x256xf32>
    %c2 = arith.constant 2 : index
    %c0_11 = arith.constant 0 : index
    %c0_12 = arith.constant 0 : index
    %19 = vector.load %arg6[%c2, %c0_11, %c0_12] : memref<9x1x256xf32, #tpu.memory_space<vmem>>, vector<1x1x256xf32>
    %20 = vector.shape_cast %19 : vector<1x1x256xf32> to vector<1x256xf32>
    %21 = vector.broadcast %20 : vector<1x256xf32> to vector<4x256xf32>
    %22 = arith.mulf %18, %21 : vector<4x256xf32>
    %c1_i32 = arith.constant 1 : i32
    %23 = tpu.dynamic_rotate %7 by %c1_i32 dim 1 : vector<4x256xf32>, i32 -> vector<4x256xf32>
    %c3 = arith.constant 3 : index
    %c0_13 = arith.constant 0 : index
    %c0_14 = arith.constant 0 : index
    %24 = vector.load %arg6[%c3, %c0_13, %c0_14] : memref<9x1x256xf32, #tpu.memory_space<vmem>>, vector<1x1x256xf32>
    %25 = vector.shape_cast %24 : vector<1x1x256xf32> to vector<1x256xf32>
    %26 = vector.broadcast %25 : vector<1x256xf32> to vector<4x256xf32>
    %27 = arith.mulf %23, %26 : vector<4x256xf32>
    %c4 = arith.constant 4 : index
    %c0_15 = arith.constant 0 : index
    %c0_16 = arith.constant 0 : index
    %28 = vector.load %arg6[%c4, %c0_15, %c0_16] : memref<9x1x256xf32, #tpu.memory_space<vmem>>, vector<1x1x256xf32>
    %29 = vector.shape_cast %28 : vector<1x1x256xf32> to vector<1x256xf32>
    %30 = vector.broadcast %29 : vector<1x256xf32> to vector<4x256xf32>
    %31 = arith.mulf %7, %30 : vector<4x256xf32>
    %c255_i32 = arith.constant 255 : i32
    %32 = tpu.dynamic_rotate %7 by %c255_i32 dim 1 : vector<4x256xf32>, i32 -> vector<4x256xf32>
    %c5 = arith.constant 5 : index
    %c0_17 = arith.constant 0 : index
    %c0_18 = arith.constant 0 : index
    %33 = vector.load %arg6[%c5, %c0_17, %c0_18] : memref<9x1x256xf32, #tpu.memory_space<vmem>>, vector<1x1x256xf32>
    %34 = vector.shape_cast %33 : vector<1x1x256xf32> to vector<1x256xf32>
    %35 = vector.broadcast %34 : vector<1x256xf32> to vector<4x256xf32>
    %36 = arith.mulf %32, %35 : vector<4x256xf32>
    %c241_i32 = arith.constant 241 : i32
    %37 = tpu.dynamic_rotate %7 by %c241_i32 dim 1 : vector<4x256xf32>, i32 -> vector<4x256xf32>
    %c6 = arith.constant 6 : index
    %c0_19 = arith.constant 0 : index
    %c0_20 = arith.constant 0 : index
    %38 = vector.load %arg6[%c6, %c0_19, %c0_20] : memref<9x1x256xf32, #tpu.memory_space<vmem>>, vector<1x1x256xf32>
    %39 = vector.shape_cast %38 : vector<1x1x256xf32> to vector<1x256xf32>
    %40 = vector.broadcast %39 : vector<1x256xf32> to vector<4x256xf32>
    %41 = arith.mulf %37, %40 : vector<4x256xf32>
    %c240_i32 = arith.constant 240 : i32
    %42 = tpu.dynamic_rotate %7 by %c240_i32 dim 1 : vector<4x256xf32>, i32 -> vector<4x256xf32>
    %c7 = arith.constant 7 : index
    %c0_21 = arith.constant 0 : index
    %c0_22 = arith.constant 0 : index
    %43 = vector.load %arg6[%c7, %c0_21, %c0_22] : memref<9x1x256xf32, #tpu.memory_space<vmem>>, vector<1x1x256xf32>
    %44 = vector.shape_cast %43 : vector<1x1x256xf32> to vector<1x256xf32>
    %45 = vector.broadcast %44 : vector<1x256xf32> to vector<4x256xf32>
    %46 = arith.mulf %42, %45 : vector<4x256xf32>
    %c239_i32 = arith.constant 239 : i32
    %47 = tpu.dynamic_rotate %7 by %c239_i32 dim 1 : vector<4x256xf32>, i32 -> vector<4x256xf32>
    %c8 = arith.constant 8 : index
    %c0_23 = arith.constant 0 : index
    %c0_24 = arith.constant 0 : index
    %48 = vector.load %arg6[%c8, %c0_23, %c0_24] : memref<9x1x256xf32, #tpu.memory_space<vmem>>, vector<1x1x256xf32>
    %49 = vector.shape_cast %48 : vector<1x1x256xf32> to vector<1x256xf32>
    %50 = vector.broadcast %49 : vector<1x256xf32> to vector<4x256xf32>
    %51 = arith.mulf %47, %50 : vector<4x256xf32>
    %52 = tpu.concatenate %12, %17, %22, %27, %31, %36, %41, %46, %51 in 0 : vector<4x256xf32>, vector<4x256xf32>, vector<4x256xf32>, vector<4x256xf32>, vector<4x256xf32>, vector<4x256xf32>, vector<4x256xf32>, vector<4x256xf32>, vector<4x256xf32> -> vector<36x256xf32>
    %53 = arith.truncf %52 : vector<36x256xf32> to vector<36x256xbf16>
    %c0_25 = arith.constant 0 : index
    %c0_26 = arith.constant 0 : index
    %54 = vector.load %arg4[%c0_25, %c0_26] : memref<8x36xbf16, #tpu.memory_space<vmem>>, vector<8x36xbf16>
    %cst_27 = arith.constant dense<0.000000e+00> : vector<8x256xf32>
    %55 = tpu.matmul %54, %53, %cst_27 {dimension_numbers = #tpu.dot_dimension_numbers<[1], [0], [0], [1], [0, 0, 1, 1], [], []>} : vector<8x36xbf16>, vector<36x256xbf16>, vector<8x256xf32> -> vector<8x256xf32>
    %c0_28 = arith.constant 0 : index
    %c0_29 = arith.constant 0 : index
    %56 = vector.load %arg5[%c0_28, %c0_29] : memref<8x1xf32, #tpu.memory_space<vmem>>, vector<8x1xf32>
    %57 = vector.broadcast %56 : vector<8x1xf32> to vector<8x256xf32>
    %58 = arith.addf %55, %57 : vector<8x256xf32>
    %59 = arith.addf %1, %58 : vector<8x256xf32>
    %c0_30 = arith.constant 0 : index
    %c0_31 = arith.constant 0 : index
    %c0_32 = arith.constant 0 : index
    %60 = vector.load %arg7[%c0_30, %c0_31, %c0_32] : memref<1x8x256xf32, #tpu.memory_space<vmem>>, vector<1x8x256xf32>
    %61 = vector.shape_cast %60 : vector<1x8x256xf32> to vector<8x256xf32>
    %62 = vector.shape_cast %59 : vector<8x256xf32> to vector<1x8x256xf32>
    tpu.vector_store %arg7[%c0_30, %c0_31, %c0_32], %62 {strides = array<i32>} : memref<1x8x256xf32, #tpu.memory_space<vmem>>, vector<1x8x256xf32>,
    return
  }
  func.func @transform_0(%arg0: i32) -> (i32, i32, i32) {
    %c0_i32 = arith.constant 0 : i32
    %c0_i32_0 = arith.constant 0 : i32
    %c0_i32_1 = arith.constant 0 : i32
    return %arg0, %c0_i32, %c0_i32_0 : i32, i32, i32
  }
  func.func @transform_1(%arg0: i32) -> (i32, i32) {
    %c0_i32 = arith.constant 0 : i32
    %c0_i32_0 = arith.constant 0 : i32
    %c0_i32_1 = arith.constant 0 : i32
    return %c0_i32, %c0_i32_0 : i32, i32
  }
  func.func @transform_2(%arg0: i32) -> (i32, i32) {
    %c0_i32 = arith.constant 0 : i32
    %c0_i32_0 = arith.constant 0 : i32
    %c0_i32_1 = arith.constant 0 : i32
    return %c0_i32, %c0_i32_0 : i32, i32
  }
  func.func @transform_3(%arg0: i32) -> (i32, i32) {
    %c0_i32 = arith.constant 0 : i32
    %c0_i32_0 = arith.constant 0 : i32
    %c0_i32_1 = arith.constant 0 : i32
    return %c0_i32, %c0_i32_0 : i32, i32
  }
  func.func @transform_4(%arg0: i32) -> (i32, i32) {
    %c0_i32 = arith.constant 0 : i32
    %c0_i32_0 = arith.constant 0 : i32
    %c0_i32_1 = arith.constant 0 : i32
    return %c0_i32, %c0_i32_0 : i32, i32
  }
  func.func @transform_5(%arg0: i32) -> (i32, i32, i32) {
    %c0_i32 = arith.constant 0 : i32
    %c0_i32_0 = arith.constant 0 : i32
    %c0_i32_1 = arith.constant 0 : i32
    %c0_i32_2 = arith.constant 0 : i32
    return %c0_i32, %c0_i32_0, %c0_i32_1 : i32, i32, i32
  }
  func.func @transform_6(%arg0: i32) -> (i32, i32, i32) {
    %c0_i32 = arith.constant 0 : i32
    %c0_i32_0 = arith.constant 0 : i32
    %c0_i32_1 = arith.constant 0 : i32
    return %arg0, %c0_i32, %c0_i32_0 : i32, i32, i32
  }
}

</mosaic_0001>

<bundles_post_ra>
// kernel: _resnet_pallas.1
= control target key start
LH: loop header
LB: loop body
LE: loop exit
PB: predicated region body
PF: predicated region fallthrough
CT: control target
= control target key end

     0   :  { %11 = vsyncpa [#allocation3], 0  ;;  %s1251_s0 = inlined_call_operand.hbm [shape: f32[2,8,256], index: 0, kind: input, shape index: {}]   ;;  %s1252_s1 = inlined_call_operand.vmem [shape: bf16[4,8], index: 1, kind: input, shape index: {}]   ;;  %s1253_s2 = inlined_call_operand.vmem [shape: f32[4,1], index: 2, kind: input, shape index: {}]   ;;  %s1254_s3 = inlined_call_operand.vmem [shape: bf16[8,36], index: 3, kind: input, shape index: {}]   ;;  %s1255_s4 = inlined_call_operand.vmem [shape: f32[8,1], index: 4, kind: input, shape index: {}]   ;;  %s1256_s5 = inlined_call_operand.vmem [shape: f32[9,1,256], index: 5, kind: input, shape index: {}]   ;;  %s1257_s6 = inlined_call_operand.hbm [shape: f32[2,8,256], index: 6, kind: output, shape index: {}]  }
   0x1   :  { %13 = vsyncpa [#allocation3 + $0x1], 0 }
   0x2   :  { %14 = vsyncpa [#allocation4], 0 }
   0x3   :  { %16 = vsyncpa [#allocation4 + $0x1], 0  ;;  %s939_s21 = smov 0   ;;  %s941_s22 = smov 0  }
   0x4   :  { %s943_s23 = smov 0   ;;  %s945_s24 = smov 0  }
   0x5 LB: > { %s960_s25 = sadd.s32 4294967295, %s891_s24   ;;  %s710_s26 = sadd.s32 4294967294, %s891_s24   ;;  %s891_s24 = sphi %s945_s24, %s1272_s24   ;;  %s887_s23 = sphi %s943_s23, %s1271_s23   ;;  %s883_s22 = sphi %s941_s22, %s1270_s22   ;;  %s879_s21 = sphi %s939_s21, %s1269_s21  }
   0x6   : > { %s964_s27 = sadd.s32 1, %s891_s24   ;;  %s29_s28 = sadd.s32 1, %s887_s23 }
   0x7   : > { %s26_s29 = ssub.s32 %s891_s24, %s964_s27  ;;  %p36_p0 = scmp.ne.s32.totalorder %s887_s23, %s883_s22 }
   0x8   : > { %p27_p1 = scmp.eq.s32.totalorder %s26_s29, 0  ;;  %p37_p2 = scmp.eq.s32.totalorder %s891_s24, 0 }
   0x9   : > { %p42_p3 = scmp.ne.s32.totalorder %s883_s22, %s879_s21  ;;  %p43_p4 = scmp.eq.s32.totalorder %s960_s25, 0 }
   0xa   : > { %s976_s30 = scalar_select %p27_p1, %s887_s23, %s29_s28  }
   0xb   : > { %p978_p5 = por %p37_p2, %p36_p0  ;;  %p982_p6 = por %p43_p4, %p42_p3 }
   0xc   : > { %p171_p7 = scmp.eq.s32.totalorder %s960_s25, 1  ;;  %p177_p8 = scmp.eq.s32.totalorder %s710_s26, 1 }
   0xd   : > { %p750_p10 = scmp.lt.s32.totalorder %s891_s24, 2  ;;  %s212_s11 = sand.u32 1, %s887_s23  }
   0xe   : > { %p989_p11 = por %p171_p7, %p36_p0  ;;  %p993_p12 = por %p177_p8, %p42_p3 }
   0xf   : > { %s736_s12 = sshll.u32 %s891_s24, 8  ;;  %s713_s13 = sshll.u32 %s212_s11, 4 }
  0x10   : > { %s1261_s9 = scalar_select %p989_p11, 1, 0 }
  0x11   : > { %s1262_s10 = scalar_select %p993_p12, 1, 0 }
  0x12   : > { %s1002_s16 = scalar_lea.hbm %s1251_s0, %s736_s12  ;;  %s216_s17 = scalar_lea.vmem [#allocation2], %s713_s13 }
  0x13   : > { %s224_s18 = sshll.u32 %s216_s17, 4  ;;  %p1006_p13 = pnand %p750_p10, %p978_p5  ;;  %s1010_s18 = int_to_ptr.vmem [resolvable:$true] %s224_s18 }
  0x14   : > { %s213_s20 = scalar_lea.sflag [#allocation3], %s212_s11  ;;  %s795_s26 = scalar_lea.hbm %s1002_s16, 256 }
  0x15   : > { %p796_p2 = scmp.ne.s32.totalorder %s1002_s16, %s795_s26  ;;  %p797_p3 = pneg %p1006_p13 }
  0x16   : > { %s800_s7 = scalar_lea.hbm %s1251_s0, 512  ;;  %p801_p5 = scmp.lt.u32.totalorder %s1002_s16, %s1251_s0 }
  0x17   : > { %p798_p4 = pnand %p797_p3, %p796_p2  ;;  %p802_p8 = scmp.lt.u32.totalorder %s800_s7, %s795_s26 }
  0x18   : > { %p804_p9 = scmp.lt.u32.totalorder %s795_s26, %s1002_s16 }
  0x19   : > { %p799_p7 = pneg %p798_p4  ;;  %p803_p10 = por %p802_p8, %p801_p5 }
  0x1b   : > { %p805_p0 = por %p804_p9, %p803_p10 }
  0x1d   : > { %p806_p1 = pnand %p805_p0, %p799_p7 }
  0x1f   : > { %809 = shalt.err (!%p806_p1)
}
  0x20   : > { %s810_s11 = scalar_lea.vmem %s1010_s18, 256  ;;  %s893_s14 = smov [#allocation2]  }
  0x21   : > { %p811_p2 = scmp.ne.s32.totalorder %s1010_s18, %s810_s11  ;;  %s815_s15 = sshll.u32 %s893_s14, 4  ;;  %s816_s15 = int_to_ptr.vmem [resolvable:$false] %s815_s15 }
  0x22   : > { %s817_s17 = scalar_lea.vmem %s816_s15, 512  ;;  %p818_p11 = scmp.lt.s32.totalorder %s1010_s18, %s816_s15 }
  0x23   : > { %p813_p4 = pnand %p811_p2, %p797_p3  ;;  %p819_p5 = scmp.lt.s32.totalorder %s817_s17, %s810_s11 }
  0x25   : > { %p814_p12 = pneg %p813_p4  ;;  %p820_p8 = por %p819_p5, %p818_p11 }
  0x27   : > { %p821_p9 = pnand %p820_p8, %p814_p12 }
  0x29   : > { %824 = shalt.err (!%p821_p9)
}
  0x2a   : > { %745 = dma.hbm_to_vmem [thread:$0]  (!%p1006_p13), %s1002_s16, 256, %s1010_s18, %s213_s20  }
  0x2b   : > { %p1264_p0 = scmp.lt.s32.totalorder %s891_s24, 3  ;;  %p1265_p1 = scmp.ge.s32.totalorder %s891_s24, 1 }
  0x2d   : > { %p230_p3 = pnand %p1265_p1, %p1264_p0 }
  0x2e   : > { %s1044_s26 = sand.u32 (!%p230_p3), 1, %s883_s22  }
  0x2f   : > { %233 = sbr.rel (%p230_p3) target bundleno = 660 (0x294), region = 44  ;;  %s717_s28 = sshll.u32 (!%p230_p3), %s1044_s26, 4 }
  0x30   : > { %s236_s29 = scalar_lea.sflag (!%p230_p3), [#allocation3], %s1044_s26  ;;  %s239_s19 = scalar_lea.vmem (!%p230_p3), [#allocation2], %s717_s28 }
  0x36   : > { %870 = dma.done.wait (%p982_p6), %s236_s29, 256  }
  0x37   : > { %872 = vsyncadd (%p982_p6), %s236_s29, 4294967040  ;;  %v894_v0 = vmov 0   ;;  %v1054_v1 = vld [vmem:[%s239_s19 + $0x8] sm:$0xff]  ;;  %vm284_vm0 = vcmask 1043456   ;;  %v1056_v2 = vld [vmem:[%s239_s19] sm:$0xff]  ;;  %vm280_vm1 = vcmask 64512   ;;  %v336_v16 = vlaneseq }
  0x38   : > { %323 = vmatprep.mubr.bf16.mxu0 %v894_v0  ;;  %793 = vset.pattern.permute.xlu0 %v894_v0  ;;  %v273_v3 = vpack.c.bf16 %v1054_v1, %v1054_v1  ;;  %v272_v4 = vpack.c.bf16 %v1056_v2, %v1056_v2  ;;  %v274_v5 = vld [vmem:[%s1253_s2] sm:$0xf]  ;;  %s895_s7 = smov 1   ;;  %s896_s12 = smov 16   ;;  %v1102_v25 = vld [vmem:[%s1256_s5 + $0x8] sm:$0x3] }
  0x39   : > { %612 = vmatprep.mubr.bf16.mxu1 %v894_v0  ;;  %794 = vset.pattern.permute.xlu1 %v894_v0  ;;  %v271_v7 = vld [vmem:[%s1252_s1] sm:$0x3]  ;;  %s897_s13 = smov 17   ;;  %s898_s11 = smov 15   ;;  %v344_v19 = vshrl.u32 %v336_v16, 7  ;;  %v1093_v22 = vand.u32 127, %v336_v16 }
  0x3a   : > { %277 = vperm.xlu0 %793, %v274_v5   ;;  %719 = vmatprep.subr.msk.bf16.mxu0 %vm284_vm0, %v273_v3  ;;  %v286_v6 = vsel %vm284_vm0, %v272_v4, 0  ;;  %s899_s14 = smov 127   ;;  %s900_s15 = smov 112   ;;  %v563_v15 = vld [vmem:[%s1255_s4] sm:$0xff]  ;;  %v725_v40 = vld [vmem:[%s1256_s5 + $0xa] sm:$0x3] }
  0x3b   : > { %292 = vmatpush1.bf16.msra.mxu0 %v286_v6  ;;  %s901_s17 = smov 113   ;;  %s902_s29 = smov 111   ;;  %v1095_v23 = vsub.s32 0, %v344_v19  ;;  %v1097_v24 = vsub.s32 1, %v344_v19  ;;  %v723_v26 = vld [vmem:[%s1256_s5 + $0x6] sm:$0x3] }
  0x3c   : > { %v341_v28 = vld [vmem:[%s1256_s5] sm:$0x3]  ;;  %v722_v30 = vld [vmem:[%s1256_s5 + $0x4] sm:$0x3]  ;;  %vm403_vm2 = vcmp.lt.s32.totalorder %v1093_v22, 1  ;;  %vm338_vm3 = vcmp.lt.s32.totalorder %v1093_v22, 17 }
  0x3d   : > { %v721_v31 = vld [vmem:[%s1256_s5 + $0x2] sm:$0x3]  ;;  %v431_v32 = vrot.slane %v1102_v25, %v1097_v24  ;;  %v427_v33 = vrot.slane %v1102_v25, %v1095_v23  ;;  %v412_v34 = vrot.slane %v723_v26, %v1095_v23  ;;  %v416_v35 = vrot.slane %v723_v26, %v1097_v24  ;;  %v727_v41 = vld [vmem:[%s1256_s5 + $0xe] sm:$0x3]  ;;  %v726_v56 = vld [vmem:[%s1256_s5 + $0xc] sm:$0x3] }
  0x3e   : > { %720 = vmatmul.mubr.msk.bf16.vlgmr.msra.gmra.mrb[0].mxu0 %vm280_vm1, %v271_v7  ;;  %vm381_vm4 = vcmp.lt.s32.totalorder %v1093_v22, 15  ;;  %v346_v36 = vrot.slane %v341_v28, %v1095_v23  ;;  %v350_v37 = vrot.slane %v341_v28, %v1097_v24  ;;  %v390_v38 = vrot.slane %v722_v30, %v1095_v23  ;;  %p1266_p11 = scmp.ne.s32.totalorder %s1261_s9, 0  ;;  %s903_s18 = smov [#allocation5]  }
  0x3f   : > { %v394_v39 = vrot.slane %v722_v30, %v1097_v24  ;;  %vm359_vm5 = vcmp.lt.s32.totalorder %v1093_v22, 16  ;;  %v368_v46 = vrot.slane %v721_v31, %v1095_v23  ;;  %v372_v49 = vrot.slane %v721_v31, %v1097_v24  ;;  %s829_s8 = sshll.u32 %s903_s18, 4  ;;  %s830_s8 = int_to_ptr.vmem [resolvable:$false] %s829_s8 }
  0x40   : > { %vm440_vm6 = vcmp.lt.s32.totalorder %v1093_v22, 127  ;;  %v449_v50 = vrot.slane %v725_v40, %v1095_v23  ;;  %v453_v51 = vrot.slane %v725_v40, %v1097_v24  ;;  %vm484_vm7 = vcmp.lt.s32.totalorder %v1093_v22, 112  ;;  %s831_s20 = scalar_lea.vmem %s830_s8, 512 }
  0x41   : > { %v493_v52 = vrot.slane %v727_v41, %v1095_v23  ;;  %v497_v55 = vrot.slane %v727_v41, %v1097_v24  ;;  %vm462_vm8 = vcmp.lt.s32.totalorder %v1093_v22, 113  ;;  %v471_v7 = vrot.slane %v726_v56, %v1095_v23 }
  0x42   : > { %vm506_vm9 = vcmp.lt.s32.totalorder %v1093_v22, 111  ;;  %vm573_vm10 = vcmask 1041408   ;;  %vm569_vm11 = vcmask 293888  }
  0xb9   : > { %v278_v8 = vpop.permute.xlu0 %277 }
 0x111   : > { %v325_v9 = vpop.f32.mrb[0].mxu0 }
 0x112   : > { %v1070_v10 = vadd.f32 %v325_v9, %v278_v8  ;;  %v327_v11 = vpop.f32.mrb[1].mxu0 }
 0x113   : > { %v329_v12 = vpop.f32.mrb[2].mxu0  ;;  %v1074_v14 = vadd.f32 %v327_v11, %v278_v8  ;;  %v475_v8 = vrot.slane %v726_v56, %v1097_v24 }
 0x114   : > { %v330_v13 = vpop.f32.mrb[3].mxu0  ;;  %399 = vrot.lane.b32.xlu1 %v1070_v10, %s895_s7  ;;  %355 = vrot.lane.b32.xlu0 %v1070_v10, %s896_s12 }
 0x118   : > { %332 = vrot.lane.b32.xlu1 %v1070_v10, %s897_s13  ;;  %401 = vrot.lane.b32.xlu0 %v1074_v14, %s895_s7 }
 0x11c   : > { %377 = vrot.lane.b32.xlu1 %v1070_v10, %s898_s11  ;;  %334 = vrot.lane.b32.xlu0 %v1074_v14, %s897_s13 }
 0x120   : > { %436 = vrot.lane.b32.xlu1 %v1070_v10, %s899_s14  ;;  %379 = vrot.lane.b32.xlu0 %v1074_v14, %s898_s11 }
 0x124   : > { %357 = vrot.lane.b32.xlu1 %v1074_v14, %s896_s12  ;;  %438 = vrot.lane.b32.xlu0 %v1074_v14, %s899_s14  ;;  %s737_s14 = sshll.u32 %s960_s25, 8  ;;  %s626_s25 = scalar_lea.sflag [#allocation4], %s1044_s26 }
 0x125   : > { %s1207_s16 = scalar_lea.hbm %s1257_s6, %s737_s14 }
 0x128   : > { %480 = vrot.lane.b32.xlu1 %v1070_v10, %s900_s15  ;;  %482 = vrot.lane.b32.xlu0 %v1074_v14, %s900_s15  ;;  %s267_s15 = scalar_lea.vmem [#allocation5], %s717_s28 }
 0x12c   : > { %458 = vrot.lane.b32.xlu1 %v1070_v10, %s901_s17  ;;  %460 = vrot.lane.b32.xlu0 %v1074_v14, %s901_s17  ;;  %s640_s17 = sshll.u32 %s267_s15, 4  ;;  %s1209_s17 = int_to_ptr.vmem [resolvable:$true] %s640_s17 }
 0x12d   : > { %s825_s28 = scalar_lea.vmem %s1209_s17, 256  ;;  %p832_p7 = scmp.lt.s32.totalorder %s1209_s17, %s830_s8 }
 0x12e   : > { %p826_p6 = scmp.ne.s32.totalorder %s1209_s17, %s825_s28  ;;  %p833_p10 = scmp.lt.s32.totalorder %s831_s20, %s825_s28 }
 0x130   : > { %502 = vrot.lane.b32.xlu1 %v1070_v10, %s902_s29  ;;  %504 = vrot.lane.b32.xlu0 %v1074_v14, %s902_s29  ;;  %p827_p12 = pnand %p826_p6, %p1266_p11  ;;  %p834_p2 = por %p833_p10, %p832_p7 }
 0x132   : > { %p828_p13 = pneg %p827_p12 }
 0x134   : > { %566 = vperm.xlu1 %794, %v563_v15   ;;  %p835_p4 = pnand %p834_p2, %p828_p13 }
 0x186   : > { %v400_v17 = vpop.permute.xlu1 %399  ;;  %v356_v18 = vpop.permute.xlu0 %355 }
 0x18a   : > { %v333_v20 = vpop.permute.xlu1 %332  ;;  %v402_v21 = vpop.permute.xlu0 %401 }
 0x18b   : > { %v404_v42 = vsel %vm403_vm2, %v400_v17, %v402_v21  ;;  %v405_v43 = vsel %vm403_vm2, %v402_v21, %v400_v17 }
 0x18c   : > { %v419_v53 = vmul.f32 %v412_v34, %v405_v43  ;;  %v420_v54 = vmul.f32 %v416_v35, %v404_v42  ;;  %v728_v35 = vld [vmem:[%s1256_s5 + $0x10] sm:$0x3]  ;;  %v435_v43 = vmul.f32 %v431_v32, %v1074_v14 }
 0x18e   : > { %v378_v27 = vpop.permute.xlu1 %377  ;;  %v335_v29 = vpop.permute.xlu0 %334  ;;  %v532_v9 = vrot.slane %v419_v53, 4  ;;  %v533_v11 = vrot.slane %v420_v54, 4 }
 0x18f   : > { %v339_v57 = vsel %vm338_vm3, %v333_v20, %v335_v29  ;;  %v340_v58 = vsel %vm338_vm3, %v335_v29, %v333_v20 }
 0x190   : > { %v353_v12 = vmul.f32 %v346_v36, %v340_v58  ;;  %v354_v13 = vmul.f32 %v350_v37, %v339_v57 }
 0x192   : > { %v437_v44 = vpop.permute.xlu1 %436  ;;  %v380_v45 = vpop.permute.xlu0 %379 }
 0x193   : > { %v382_v47 = vsel %vm381_vm4, %v378_v27, %v380_v45  ;;  %v383_v48 = vsel %vm381_vm4, %v380_v45, %v378_v27 }
 0x194   : > { %v397_v59 = vmul.f32 %v390_v38, %v383_v48  ;;  %v398_v60 = vmul.f32 %v394_v39, %v382_v47  ;;  %v434_v38 = vmul.f32 %v427_v33, %v1070_v10  ;;  %v515_v10 = vrot.slane %v728_v35, %v1095_v23 }
 0x195   : > { %v519_v33 = vrot.slane %v728_v35, %v1097_v24 }
 0x196   : > { %v358_v61 = vpop.permute.xlu1 %357  ;;  %v439_v62 = vpop.permute.xlu0 %438  ;;  %v551_v27 = vsel %vm284_vm0, %v398_v60, %v533_v11  ;;  %v550_v28 = vsel %vm284_vm0, %v397_v59, %v532_v9  ;;  %v562_v60 = vld [vmem:[%s1254_s3] sm:$0xf] }
 0x197   : > { %v360_v63 = vsel %vm359_vm5, %v356_v18, %v358_v61  ;;  %v361_v0 = vsel %vm359_vm5, %v358_v61, %v356_v18  ;;  %v441_v3 = vsel %vm440_vm6, %v437_v44, %v439_v62  ;;  %v442_v4 = vsel %vm440_vm6, %v439_v62, %v437_v44 }
 0x198   : > { %v375_v5 = vmul.f32 %v368_v46, %v361_v0  ;;  %v376_v6 = vmul.f32 %v372_v49, %v360_v63  ;;  %v456_v17 = vmul.f32 %v449_v50, %v441_v3  ;;  %v457_v18 = vmul.f32 %v453_v51, %v442_v4 }
 0x19a   : > { %v526_v15 = vrot.slane %v375_v5, 4  ;;  %v527_v16 = vrot.slane %v376_v6, 4  ;;  %v481_v19 = vpop.permute.xlu1 %480  ;;  %v483_v20 = vpop.permute.xlu0 %482  ;;  %v538_v39 = vrot.slane %v456_v17, 4  ;;  %v539_v40 = vrot.slane %v457_v18, 4 }
 0x19b   : > { %v485_v21 = vsel %vm484_vm7, %v481_v19, %v483_v20  ;;  %v486_v26 = vsel %vm484_vm7, %v483_v20, %v481_v19 }
 0x19c   : > { %v500_v29 = vmul.f32 %v493_v52, %v485_v21  ;;  %v501_v30 = vmul.f32 %v497_v55, %v486_v26  ;;  %v549_v31 = vsel %vm284_vm0, %v354_v13, %v527_v16  ;;  %v548_v34 = vsel %vm284_vm0, %v353_v12, %v526_v15 }
 0x19d   : > { %v557_v36 = vpack.c.bf16 %v551_v27, %v549_v31  ;;  %v556_v37 = vpack.c.bf16 %v550_v28, %v548_v34  ;;  %v553_v14 = vsel %vm284_vm0, %v435_v43, %v539_v40  ;;  %v552_v32 = vsel %vm284_vm0, %v434_v38, %v538_v39 }
 0x19e   : > { %v459_v41 = vpop.permute.xlu1 %458  ;;  %v461_v42 = vpop.permute.xlu0 %460  ;;  %v544_v46 = vrot.slane %v500_v29, 4  ;;  %v545_v47 = vrot.slane %v501_v30, 4 }
 0x19f   : > { %v463_v44 = vsel %vm462_vm8, %v459_v41, %v461_v42  ;;  %v464_v45 = vsel %vm462_vm8, %v461_v42, %v459_v41  ;;  %580 = vmatprep.subr.bf16.mxu1 %v557_v36 }
 0x1a0   : > { %v478_v48 = vmul.f32 %v471_v7, %v463_v44  ;;  %v479_v49 = vmul.f32 %v475_v8, %v464_v45  ;;  %581 = vmatpush1.bf16.msra.mxu1 %v556_v37 }
 0x1a2   : > { %v503_v50 = vpop.permute.xlu1 %502  ;;  %v505_v51 = vpop.permute.xlu0 %504  ;;  %v555_v25 = vsel %vm284_vm0, %v479_v49, %v545_v47  ;;  %v554_v52 = vsel %vm284_vm0, %v478_v48, %v544_v46 }
 0x1a3   : > { %v507_v23 = vsel %vm506_vm9, %v503_v50, %v505_v51  ;;  %v508_v24 = vsel %vm506_vm9, %v505_v51, %v503_v50  ;;  %v559_v53 = vpack.c.bf16 %v555_v25, %v553_v14  ;;  %v558_v54 = vpack.c.bf16 %v554_v52, %v552_v32 }
 0x1a4   : > { %v522_v55 = vmul.f32 %v515_v10, %v507_v23  ;;  %v523_v56 = vmul.f32 %v519_v33, %v508_v24 }
 0x1a5   : > { %582 = vmatprep.subr.bf16.mxu1 %v559_v53 }
 0x1a6   : > { %v560_v57 = vpack.c.bf16 %v522_v55, %v522_v55  ;;  %v561_v58 = vpack.c.bf16 %v523_v56, %v523_v56  ;;  %583 = vmatpush1.bf16.msra.mxu1 %v558_v54 }
 0x1a8   : > { %729 = vmatprep.subr.msk.bf16.mxu1 %vm573_vm10, %v561_v58  ;;  %v575_v59 = vsel %vm573_vm10, %v560_v57, 0 }
 0x1aa   : > { %585 = vmatpush1.bf16.msra.mxu1 %v575_v59 }
 0x1ad   : > { %730 = vmatmul.mubr.msk.bf16.vlgmr.msra.gmra.mrb[0].mxu1 %vm569_vm11, %v562_v60 }
 0x1b3   : > { %v567_v22 = vpop.permute.xlu1 %566 }
 0x280   : > { %v614_v61 = vpop.f32.mrb[0].mxu1 }
 0x281   : > { %v615_v62 = vadd.f32 %v614_v61, %v567_v22  ;;  %v616_v63 = vpop.f32.mrb[1].mxu1 }
 0x282   : > { %v617_v0 = vadd.f32 %v616_v63, %v567_v22  ;;  %v618_v3 = vpop.f32.mrb[2].mxu1 }
 0x283   : > { %v621_v4 = vadd.f32 %v615_v62, %v1056_v2  ;;  %v619_v5 = vpop.f32.mrb[3].mxu1 }
 0x284   : > { %v622_v6 = vadd.f32 %v617_v0, %v1054_v1 }
 0x285   : > { %623 = vst [vmem:[%s267_s15] sm:$0xff] %v621_v4 }
 0x286   : > { %624 = vst [vmem:[%s267_s15 + $0x8] sm:$0xff] %v622_v6 }
 0x287   : > { %838 = shalt.err (!%p835_p4)
}
 0x288   : > { %s839_s26 = scalar_lea.hbm %s1207_s16, 256  ;;  %s843_s13 = scalar_lea.hbm %s1257_s6, 512 }
 0x289   : > { %p840_p5 = scmp.ne.s32.totalorder %s1207_s16, %s839_s26  ;;  %p844_p0 = scmp.lt.u32.totalorder %s1207_s16, %s1257_s6 }
 0x28a   : > { %p845_p1 = scmp.lt.u32.totalorder %s843_s13, %s839_s26  ;;  %p847_p6 = scmp.lt.u32.totalorder %s839_s26, %s1207_s16 }
 0x28b   : > { %p841_p8 = pnand %p840_p5, %p1266_p11 }
 0x28c   : > { %p846_p3 = por %p845_p1, %p844_p0 }
 0x28d   : > { %p842_p9 = pneg %p841_p8 }
 0x28e   : > { %p848_p12 = por %p847_p6, %p846_p3 }
 0x290   : > { %p849_p13 = pnand %p848_p12, %p842_p9 }
 0x292   : > { %852 = shalt.err (!%p849_p13)
}
 0x293   : > { %740 = dma.vmem_to_hbm [thread:$0]  (%p1266_p11), %s1209_s17, 256, %s1207_s16, %s626_s25  }
 0x294 PF: > { %s652_s15 = sand.u32 1, %s879_s21   ;;  %p1267_p7 = scmp.ne.s32.totalorder %s1262_s10, 0 }
 0x295   : > { %p1268_p10 = scmp.ge.s32.totalorder %s891_s24, 2  ;;  %s653_s29 = scalar_lea.sflag [#allocation4], %s652_s15 }
 0x297   : > { %p747_p2 = pnand %p1268_p10, %p1267_p7 }
 0x299   : > { %874 = dma.done.wait (!%p747_p2), %s653_s29, 256  }
 0x29a   : > { %876 = vsyncadd (!%p747_p2), %s653_s29, 4294967040  ;;  %p19_p4 = scmp.ge.s32.totalorder %s964_s27, 4   ;;  %s1269_s21 = smov %s883_s22 }
 0x29b   : > { %s1270_s22 = smov %s887_s23  ;;  %s1271_s23 = smov %s976_s30 }
 0x29c   : > { %s1272_s24 = smov %s964_s27  ;;  %21 = sbr.rel (!%p19_p4) target bundleno = 5 (0x5), region = 97 }
 0x2a3   :  { %658 = vsyncpa [#allocation3], 1 }
 0x2a4   :  { %660 = vsyncpa [#allocation3 + $0x1], 1 }
 0x2a5   :  { %661 = vsyncpa [#allocation4], 1 }
 0x2a6   :  { %663 = vsyncpa [#allocation4 + $0x1], 1 }

</bundles_post_ra>
